<compile_context>
chip_gen: v6e
topology: v6e:2x2x1
jax: 0.10.0
libtpu: 0.0.40
codegen_flags: <defaults>
</compile_context>

<pallas_src>
import functools
import math

import jax
import jax.numpy as jnp
from jax import lax
from jax.experimental import pallas as pl


# ----------------------------- Pallas kernel ------------------------------- #

def _fused_self_attention_kernel(x_ref, wqkv_ref, wh_ref, o_ref, *, B, T, D, H):
    HD = H * D
    x = x_ref[...]                                               # (B*T, D) bf16

    # One MXU pass for Q, K, V (output last dim 3*H*D = 384, lane-dense).
    # Q columns are pre-scaled by 1/sqrt(kDim) in the weight.
    qkv = jnp.dot(x, wqkv_ref[...],
                  preferred_element_type=jnp.float32)            # (B*T, 3*H*D) f32
    q = qkv[:, 0 * HD:1 * HD]
    k = qkv[:, 1 * HD:2 * HD]
    v = qkv[:, 2 * HD:3 * HD]

    # Small static trip count (B*H = 8): fully unrolled so the scheduler can
    # interleave the tiny matmuls / softmaxes.  Head outputs are kept in
    # registers and concatenated (lane-concat per batch, sublane-concat over
    # batches) -- no VMEM scratch, no masked partial stores.
    batch_slabs = []
    for b in range(B):
        r0, r1 = b * T, (b + 1) * T
        head_outs = []
        for h in range(H):
            c0, c1 = h * D, (h + 1) * D
            qh = q[r0:r1, c0:c1]                                 # (T, D)
            kh = k[r0:r1, c0:c1]                                 # (T, D)
            vh = v[r0:r1, c0:c1]                                 # (T, D)

            # Contract on the last dim of both operands (q @ k^T) -- no host
            # side transpose of k; RHS orientation left to the compiler.
            s = lax.dot_general(
                qh, kh, dimension_numbers=(((1,), (1,)), ((), ())),
                preferred_element_type=jnp.float32)              # (T, T)

            # softmax over the last axis (PyTorch Softmax(dim=3)), f32 math.
            m = jnp.max(s, axis=-1, keepdims=True)
            e = jnp.exp(s - m)
            # approx=True -> EUP vrcp (free slot) instead of VALU Newton.
            p = e * pl.reciprocal(jnp.sum(e, axis=-1, keepdims=True),
                                  approx=True)

            head_outs.append(jnp.dot(p, vh,
                                     preferred_element_type=jnp.float32))

        batch_slabs.append(jnp.concatenate(head_outs, axis=1))   # (T, H*D)

    merged = jnp.concatenate(batch_slabs, axis=0)                # (B*T, H*D) in regs

    # Single merged output projection on the lane-dense (B*T, 128) slab.
    out = jnp.dot(merged.astype(wh_ref.dtype), wh_ref[...],
                  preferred_element_type=jnp.float32)            # (B*T, D)
    o_ref[...] = out.astype(o_ref.dtype)


def fused_self_attention(x2d, w_qkv, w_h, *, B, T, D, H):
    """x2d: (B*T, D) bf16; w_qkv: (D, 3*H*D) bf16 [Q cols pre-scaled]; w_h: (H*D, D) bf16."""
    kernel = functools.partial(_fused_self_attention_kernel,
                               B=B, T=T, D=D, H=H)
    # grid=(1,) on purpose: the whole problem fits in VMEM and each extra grid
    # step would cost ~0.35us of fixed pipelining overhead (> one head's work).
    return pl.pallas_call(
        kernel,
        out_shape=jax.ShapeDtypeStruct((B * T, D), jnp.float32),
        grid=(1,),
        in_specs=[
            pl.BlockSpec((B * T, D), lambda i: (0, 0)),
            pl.BlockSpec((D, 3 * H * D), lambda i: (0, 0)),
            pl.BlockSpec((H * D, D), lambda i: (0, 0)),
        ],
        out_specs=pl.BlockSpec((B * T, D), lambda i: (0, 0)),
    )(x2d, w_qkv, w_h)


# ----------------------------- Module wrapper ------------------------------ #

class SelfAttentionPallas:
    def __init__(self, dDim=32, numOfHeads=4, key=None):
        self.dDim = dDim
        self.kDim = dDim
        self.numOfHeads = numOfHeads
        if key is None:
            key = jax.random.PRNGKey(0)
        kq, kk, kv, kh = jax.random.split(key, 4)
        scale_in = 1.0 / math.sqrt(dDim)
        scale_out = 1.0 / math.sqrt(dDim * numOfHeads)
        # Weights stored (in, out) -- PyTorch nn.Linear computes x @ W.T, we
        # pre-transpose.  Stored as bf16 (MXU-native on v5e/v6e/v7x, halves
        # weight DMA); all matmuls accumulate in f32.
        self.wQ = jax.random.uniform(kq, (dDim, dDim * numOfHeads), jnp.float32,
                                     -scale_in, scale_in).astype(jnp.bfloat16)
        self.wK = jax.random.uniform(kk, (dDim, dDim * numOfHeads), jnp.float32,
                                     -scale_in, scale_in).astype(jnp.bfloat16)
        self.wV = jax.random.uniform(kv, (dDim, dDim * numOfHeads), jnp.float32,
                                     -scale_in, scale_in).astype(jnp.bfloat16)
        self.wH = jax.random.uniform(kh, (dDim * numOfHeads, dDim), jnp.float32,
                                     -scale_out, scale_out).astype(jnp.bfloat16)
        # Merged QKV weight; fold the 1/sqrt(kDim) attention scale into the
        # Q columns (mathematically equivalent, zero runtime cost).
        score_scale = 1.0 / math.sqrt(self.kDim)
        self.w_qkv = jnp.concatenate(
            [(self.wQ.astype(jnp.float32) * score_scale).astype(jnp.bfloat16),
             self.wK, self.wV], axis=1)

    def forward(self, x):
        B, T, D = x.shape
        assert D == self.dDim
        H = self.numOfHeads
        x2d = x.reshape(B * T, D).astype(jnp.bfloat16)
        out = fused_self_attention(x2d, self.w_qkv, self.wH,
                                   B=B, T=T, D=D, H=H)
        return out.reshape(B, T, D)

    # pure-JAX f32 reference for verification (mirrors the PyTorch module,
    # using the same bf16 parameters upcast to f32, HIGHEST matmul precision).
    def forward_ref(self, x):
        B, T, D = x.shape
        H = self.numOfHeads
        hp = jax.lax.Precision.HIGHEST
        wQ = self.wQ.astype(jnp.float32)
        wK = self.wK.astype(jnp.float32)
        wV = self.wV.astype(jnp.float32)
        wH = self.wH.astype(jnp.float32)
        q = jnp.dot(x, wQ, precision=hp).reshape(B, T, H, D).transpose(0, 2, 1, 3)
        k = jnp.dot(x, wK, precision=hp).reshape(B, T, H, D).transpose(0, 2, 1, 3)
        v = jnp.dot(x, wV, precision=hp).reshape(B, T, H, D).transpose(0, 2, 1, 3)
        a = jnp.einsum("bhtd,bhsd->bhts", q, k, precision=hp) / math.sqrt(self.kDim)
        a = jax.nn.softmax(a, axis=-1)
        h = jnp.einsum("bhts,bhsd->bhtd", a, v, precision=hp)
        h = h.transpose(0, 2, 1, 3).reshape(B, T, H * D)
        return jnp.dot(h, wH, precision=hp)


# --------------------------------- Main ------------------------------------ #

if __name__ == "__main__":
    key = jax.random.PRNGKey(0)
    k_param, k_x = jax.random.split(key)

    B, T, D, H = 2, 8, 32, 4
    module = SelfAttentionPallas(dDim=D, numOfHeads=H, key=k_param)
    x = jax.random.normal(k_x, (B, T, D), dtype=jnp.float32)

    out = module.forward(x)
    out = jax.block_until_ready(out)

    ref = module.forward_ref(x)
    assert out.shape == (B, T, D)
    # Tolerance reflects bf16 parameters / bf16 activations into the MXU
    # (f32 accumulation) and the approx EUP reciprocal; comfortably within 1e-2.
    assert jnp.allclose(out, ref, atol=1e-2, rtol=1e-2), "mismatch vs reference"

    print("KERNEL_OK")
</pallas_src>

<mosaic_0001>
module attributes {stable_mosaic.version = 11 : i64} {
  func.func @_fused_self_attention_kernel(%arg0: i32, %arg1: memref<16x32xbf16, #tpu.memory_space<vmem>>, %arg2: memref<32x384xbf16, #tpu.memory_space<vmem>>, %arg3: memref<128x32xbf16, #tpu.memory_space<vmem>>, %arg4: memref<16x32xf32, #tpu.memory_space<vmem>>) attributes {dimension_semantics = [#tpu.dimension_semantics<arbitrary>], iteration_bounds = array<i64: 1>, scalar_prefetch = 0 : i64, scratch_operands = 0 : i64, tpu.core_type = #tpu.core_type<tc>, window_params = [{pipeline_mode = #tpu.pipeline_mode<synchronous>, transform_indices = @transform_0, window_bounds = array<i64: 16, 32>}, {pipeline_mode = #tpu.pipeline_mode<synchronous>, transform_indices = @transform_1, window_bounds = array<i64: 32, 384>}, {pipeline_mode = #tpu.pipeline_mode<synchronous>, transform_indices = @transform_2, window_bounds = array<i64: 128, 32>}, {pipeline_mode = #tpu.pipeline_mode<synchronous>, transform_indices = @transform_3, window_bounds = array<i64: 16, 32>}]} {
    %c0 = arith.constant 0 : index
    %c0_0 = arith.constant 0 : index
    %0 = vector.load %arg1[%c0, %c0_0] : memref<16x32xbf16, #tpu.memory_space<vmem>>, vector<16x32xbf16>
    %c0_1 = arith.constant 0 : index
    %c0_2 = arith.constant 0 : index
    %1 = vector.load %arg2[%c0_1, %c0_2] : memref<32x384xbf16, #tpu.memory_space<vmem>>, vector<32x384xbf16>
    %cst = arith.constant dense<0.000000e+00> : vector<16x384xf32>
    %2 = tpu.matmul %0, %1, %cst {dimension_numbers = #tpu.dot_dimension_numbers<[1], [0], [0], [1], [0, 0, 1, 1], [], []>} : vector<16x32xbf16>, vector<32x384xbf16>, vector<16x384xf32> -> vector<16x384xf32>
    %3 = vector.extract_strided_slice %2 {offsets = [0, 0], sizes = [16, 128], strides = [1, 1]} : vector<16x384xf32> to vector<16x128xf32>
    %4 = vector.extract_strided_slice %2 {offsets = [0, 128], sizes = [16, 128], strides = [1, 1]} : vector<16x384xf32> to vector<16x128xf32>
    %5 = vector.extract_strided_slice %2 {offsets = [0, 256], sizes = [16, 128], strides = [1, 1]} : vector<16x384xf32> to vector<16x128xf32>
    %6 = vector.extract_strided_slice %3 {offsets = [0, 0], sizes = [8, 32], strides = [1, 1]} : vector<16x128xf32> to vector<8x32xf32>
    %7 = vector.extract_strided_slice %4 {offsets = [0, 0], sizes = [8, 32], strides = [1, 1]} : vector<16x128xf32> to vector<8x32xf32>
    %8 = vector.extract_strided_slice %5 {offsets = [0, 0], sizes = [8, 32], strides = [1, 1]} : vector<16x128xf32> to vector<8x32xf32>
    %cst_3 = arith.constant dense<0.000000e+00> : vector<8x8xf32>
    %9 = tpu.matmul %6, %7, %cst_3 {dimension_numbers = #tpu.dot_dimension_numbers<[1], [1], [0], [0], [0, 0, 1, 0], [], []>} : vector<8x32xf32>, vector<8x32xf32>, vector<8x8xf32> -> vector<8x8xf32>
    %cst_4 = arith.constant dense<0xFF800000> : vector<8xf32>
    %10 = vector.multi_reduction <maximumf>, %9, %cst_4 [1] : vector<8x8xf32> to vector<8xf32>
    %11 = vector.shape_cast %10 : vector<8xf32> to vector<8x1xf32>
    %12 = vector.broadcast %11 : vector<8x1xf32> to vector<8x8xf32>
    %13 = arith.subf %9, %12 : vector<8x8xf32>
    %14 = math.exp %13 : vector<8x8xf32>
    %cst_5 = arith.constant dense<0.000000e+00> : vector<8xf32>
    %15 = vector.multi_reduction <add>, %14, %cst_5 [1] : vector<8x8xf32> to vector<8xf32>
    %16 = vector.shape_cast %15 : vector<8xf32> to vector<8x1xf32>
    %17 = tpu.reciprocal %16 {approx = true} : vector<8x1xf32> -> vector<8x1xf32>
    %18 = vector.broadcast %17 : vector<8x1xf32> to vector<8x8xf32>
    %19 = arith.mulf %14, %18 : vector<8x8xf32>
    %cst_6 = arith.constant dense<0.000000e+00> : vector<8x32xf32>
    %20 = tpu.matmul %19, %8, %cst_6 {dimension_numbers = #tpu.dot_dimension_numbers<[1], [0], [0], [1], [0, 0, 1, 1], [], []>} : vector<8x8xf32>, vector<8x32xf32>, vector<8x32xf32> -> vector<8x32xf32>
    %21 = vector.extract_strided_slice %3 {offsets = [0, 32], sizes = [8, 32], strides = [1, 1]} : vector<16x128xf32> to vector<8x32xf32>
    %22 = vector.extract_strided_slice %4 {offsets = [0, 32], sizes = [8, 32], strides = [1, 1]} : vector<16x128xf32> to vector<8x32xf32>
    %23 = vector.extract_strided_slice %5 {offsets = [0, 32], sizes = [8, 32], strides = [1, 1]} : vector<16x128xf32> to vector<8x32xf32>
    %cst_7 = arith.constant dense<0.000000e+00> : vector<8x8xf32>
    %24 = tpu.matmul %21, %22, %cst_7 {dimension_numbers = #tpu.dot_dimension_numbers<[1], [1], [0], [0], [0, 0, 1, 0], [], []>} : vector<8x32xf32>, vector<8x32xf32>, vector<8x8xf32> -> vector<8x8xf32>
    %cst_8 = arith.constant dense<0xFF800000> : vector<8xf32>
    %25 = vector.multi_reduction <maximumf>, %24, %cst_8 [1] : vector<8x8xf32> to vector<8xf32>
    %26 = vector.shape_cast %25 : vector<8xf32> to vector<8x1xf32>
    %27 = vector.broadcast %26 : vector<8x1xf32> to vector<8x8xf32>
    %28 = arith.subf %24, %27 : vector<8x8xf32>
    %29 = math.exp %28 : vector<8x8xf32>
    %cst_9 = arith.constant dense<0.000000e+00> : vector<8xf32>
    %30 = vector.multi_reduction <add>, %29, %cst_9 [1] : vector<8x8xf32> to vector<8xf32>
    %31 = vector.shape_cast %30 : vector<8xf32> to vector<8x1xf32>
    %32 = tpu.reciprocal %31 {approx = true} : vector<8x1xf32> -> vector<8x1xf32>
    %33 = vector.broadcast %32 : vector<8x1xf32> to vector<8x8xf32>
    %34 = arith.mulf %29, %33 : vector<8x8xf32>
    %cst_10 = arith.constant dense<0.000000e+00> : vector<8x32xf32>
    %35 = tpu.matmul %34, %23, %cst_10 {dimension_numbers = #tpu.dot_dimension_numbers<[1], [0], [0], [1], [0, 0, 1, 1], [], []>} : vector<8x8xf32>, vector<8x32xf32>, vector<8x32xf32> -> vector<8x32xf32>
    %36 = vector.extract_strided_slice %3 {offsets = [0, 64], sizes = [8, 32], strides = [1, 1]} : vector<16x128xf32> to vector<8x32xf32>
    %37 = vector.extract_strided_slice %4 {offsets = [0, 64], sizes = [8, 32], strides = [1, 1]} : vector<16x128xf32> to vector<8x32xf32>
    %38 = vector.extract_strided_slice %5 {offsets = [0, 64], sizes = [8, 32], strides = [1, 1]} : vector<16x128xf32> to vector<8x32xf32>
    %cst_11 = arith.constant dense<0.000000e+00> : vector<8x8xf32>
    %39 = tpu.matmul %36, %37, %cst_11 {dimension_numbers = #tpu.dot_dimension_numbers<[1], [1], [0], [0], [0, 0, 1, 0], [], []>} : vector<8x32xf32>, vector<8x32xf32>, vector<8x8xf32> -> vector<8x8xf32>
    %cst_12 = arith.constant dense<0xFF800000> : vector<8xf32>
    %40 = vector.multi_reduction <maximumf>, %39, %cst_12 [1] : vector<8x8xf32> to vector<8xf32>
    %41 = vector.shape_cast %40 : vector<8xf32> to vector<8x1xf32>
    %42 = vector.broadcast %41 : vector<8x1xf32> to vector<8x8xf32>
    %43 = arith.subf %39, %42 : vector<8x8xf32>
    %44 = math.exp %43 : vector<8x8xf32>
    %cst_13 = arith.constant dense<0.000000e+00> : vector<8xf32>
    %45 = vector.multi_reduction <add>, %44, %cst_13 [1] : vector<8x8xf32> to vector<8xf32>
    %46 = vector.shape_cast %45 : vector<8xf32> to vector<8x1xf32>
    %47 = tpu.reciprocal %46 {approx = true} : vector<8x1xf32> -> vector<8x1xf32>
    %48 = vector.broadcast %47 : vector<8x1xf32> to vector<8x8xf32>
    %49 = arith.mulf %44, %48 : vector<8x8xf32>
    %cst_14 = arith.constant dense<0.000000e+00> : vector<8x32xf32>
    %50 = tpu.matmul %49, %38, %cst_14 {dimension_numbers = #tpu.dot_dimension_numbers<[1], [0], [0], [1], [0, 0, 1, 1], [], []>} : vector<8x8xf32>, vector<8x32xf32>, vector<8x32xf32> -> vector<8x32xf32>
    %51 = vector.extract_strided_slice %3 {offsets = [0, 96], sizes = [8, 32], strides = [1, 1]} : vector<16x128xf32> to vector<8x32xf32>
    %52 = vector.extract_strided_slice %4 {offsets = [0, 96], sizes = [8, 32], strides = [1, 1]} : vector<16x128xf32> to vector<8x32xf32>
    %53 = vector.extract_strided_slice %5 {offsets = [0, 96], sizes = [8, 32], strides = [1, 1]} : vector<16x128xf32> to vector<8x32xf32>
    %cst_15 = arith.constant dense<0.000000e+00> : vector<8x8xf32>
    %54 = tpu.matmul %51, %52, %cst_15 {dimension_numbers = #tpu.dot_dimension_numbers<[1], [1], [0], [0], [0, 0, 1, 0], [], []>} : vector<8x32xf32>, vector<8x32xf32>, vector<8x8xf32> -> vector<8x8xf32>
    %cst_16 = arith.constant dense<0xFF800000> : vector<8xf32>
    %55 = vector.multi_reduction <maximumf>, %54, %cst_16 [1] : vector<8x8xf32> to vector<8xf32>
    %56 = vector.shape_cast %55 : vector<8xf32> to vector<8x1xf32>
    %57 = vector.broadcast %56 : vector<8x1xf32> to vector<8x8xf32>
    %58 = arith.subf %54, %57 : vector<8x8xf32>
    %59 = math.exp %58 : vector<8x8xf32>
    %cst_17 = arith.constant dense<0.000000e+00> : vector<8xf32>
    %60 = vector.multi_reduction <add>, %59, %cst_17 [1] : vector<8x8xf32> to vector<8xf32>
    %61 = vector.shape_cast %60 : vector<8xf32> to vector<8x1xf32>
    %62 = tpu.reciprocal %61 {approx = true} : vector<8x1xf32> -> vector<8x1xf32>
    %63 = vector.broadcast %62 : vector<8x1xf32> to vector<8x8xf32>
    %64 = arith.mulf %59, %63 : vector<8x8xf32>
    %cst_18 = arith.constant dense<0.000000e+00> : vector<8x32xf32>
    %65 = tpu.matmul %64, %53, %cst_18 {dimension_numbers = #tpu.dot_dimension_numbers<[1], [0], [0], [1], [0, 0, 1, 1], [], []>} : vector<8x8xf32>, vector<8x32xf32>, vector<8x32xf32> -> vector<8x32xf32>
    %66 = tpu.concatenate %20, %35, %50, %65 in 1 : vector<8x32xf32>, vector<8x32xf32>, vector<8x32xf32>, vector<8x32xf32> -> vector<8x128xf32>
    %67 = vector.extract_strided_slice %3 {offsets = [8, 0], sizes = [8, 32], strides = [1, 1]} : vector<16x128xf32> to vector<8x32xf32>
    %68 = vector.extract_strided_slice %4 {offsets = [8, 0], sizes = [8, 32], strides = [1, 1]} : vector<16x128xf32> to vector<8x32xf32>
    %69 = vector.extract_strided_slice %5 {offsets = [8, 0], sizes = [8, 32], strides = [1, 1]} : vector<16x128xf32> to vector<8x32xf32>
    %cst_19 = arith.constant dense<0.000000e+00> : vector<8x8xf32>
    %70 = tpu.matmul %67, %68, %cst_19 {dimension_numbers = #tpu.dot_dimension_numbers<[1], [1], [0], [0], [0, 0, 1, 0], [], []>} : vector<8x32xf32>, vector<8x32xf32>, vector<8x8xf32> -> vector<8x8xf32>
    %cst_20 = arith.constant dense<0xFF800000> : vector<8xf32>
    %71 = vector.multi_reduction <maximumf>, %70, %cst_20 [1] : vector<8x8xf32> to vector<8xf32>
    %72 = vector.shape_cast %71 : vector<8xf32> to vector<8x1xf32>
    %73 = vector.broadcast %72 : vector<8x1xf32> to vector<8x8xf32>
    %74 = arith.subf %70, %73 : vector<8x8xf32>
    %75 = math.exp %74 : vector<8x8xf32>
    %cst_21 = arith.constant dense<0.000000e+00> : vector<8xf32>
    %76 = vector.multi_reduction <add>, %75, %cst_21 [1] : vector<8x8xf32> to vector<8xf32>
    %77 = vector.shape_cast %76 : vector<8xf32> to vector<8x1xf32>
    %78 = tpu.reciprocal %77 {approx = true} : vector<8x1xf32> -> vector<8x1xf32>
    %79 = vector.broadcast %78 : vector<8x1xf32> to vector<8x8xf32>
    %80 = arith.mulf %75, %79 : vector<8x8xf32>
    %cst_22 = arith.constant dense<0.000000e+00> : vector<8x32xf32>
    %81 = tpu.matmul %80, %69, %cst_22 {dimension_numbers = #tpu.dot_dimension_numbers<[1], [0], [0], [1], [0, 0, 1, 1], [], []>} : vector<8x8xf32>, vector<8x32xf32>, vector<8x32xf32> -> vector<8x32xf32>
    %82 = vector.extract_strided_slice %3 {offsets = [8, 32], sizes = [8, 32], strides = [1, 1]} : vector<16x128xf32> to vector<8x32xf32>
    %83 = vector.extract_strided_slice %4 {offsets = [8, 32], sizes = [8, 32], strides = [1, 1]} : vector<16x128xf32> to vector<8x32xf32>
    %84 = vector.extract_strided_slice %5 {offsets = [8, 32], sizes = [8, 32], strides = [1, 1]} : vector<16x128xf32> to vector<8x32xf32>
    %cst_23 = arith.constant dense<0.000000e+00> : vector<8x8xf32>
    %85 = tpu.matmul %82, %83, %cst_23 {dimension_numbers = #tpu.dot_dimension_numbers<[1], [1], [0], [0], [0, 0, 1, 0], [], []>} : vector<8x32xf32>, vector<8x32xf32>, vector<8x8xf32> -> vector<8x8xf32>
    %cst_24 = arith.constant dense<0xFF800000> : vector<8xf32>
    %86 = vector.multi_reduction <maximumf>, %85, %cst_24 [1] : vector<8x8xf32> to vector<8xf32>
    %87 = vector.shape_cast %86 : vector<8xf32> to vector<8x1xf32>
    %88 = vector.broadcast %87 : vector<8x1xf32> to vector<8x8xf32>
    %89 = arith.subf %85, %88 : vector<8x8xf32>
    %90 = math.exp %89 : vector<8x8xf32>
    %cst_25 = arith.constant dense<0.000000e+00> : vector<8xf32>
    %91 = vector.multi_reduction <add>, %90, %cst_25 [1] : vector<8x8xf32> to vector<8xf32>
    %92 = vector.shape_cast %91 : vector<8xf32> to vector<8x1xf32>
    %93 = tpu.reciprocal %92 {approx = true} : vector<8x1xf32> -> vector<8x1xf32>
    %94 = vector.broadcast %93 : vector<8x1xf32> to vector<8x8xf32>
    %95 = arith.mulf %90, %94 : vector<8x8xf32>
    %cst_26 = arith.constant dense<0.000000e+00> : vector<8x32xf32>
    %96 = tpu.matmul %95, %84, %cst_26 {dimension_numbers = #tpu.dot_dimension_numbers<[1], [0], [0], [1], [0, 0, 1, 1], [], []>} : vector<8x8xf32>, vector<8x32xf32>, vector<8x32xf32> -> vector<8x32xf32>
    %97 = vector.extract_strided_slice %3 {offsets = [8, 64], sizes = [8, 32], strides = [1, 1]} : vector<16x128xf32> to vector<8x32xf32>
    %98 = vector.extract_strided_slice %4 {offsets = [8, 64], sizes = [8, 32], strides = [1, 1]} : vector<16x128xf32> to vector<8x32xf32>
    %99 = vector.extract_strided_slice %5 {offsets = [8, 64], sizes = [8, 32], strides = [1, 1]} : vector<16x128xf32> to vector<8x32xf32>
    %cst_27 = arith.constant dense<0.000000e+00> : vector<8x8xf32>
    %100 = tpu.matmul %97, %98, %cst_27 {dimension_numbers = #tpu.dot_dimension_numbers<[1], [1], [0], [0], [0, 0, 1, 0], [], []>} : vector<8x32xf32>, vector<8x32xf32>, vector<8x8xf32> -> vector<8x8xf32>
    %cst_28 = arith.constant dense<0xFF800000> : vector<8xf32>
    %101 = vector.multi_reduction <maximumf>, %100, %cst_28 [1] : vector<8x8xf32> to vector<8xf32>
    %102 = vector.shape_cast %101 : vector<8xf32> to vector<8x1xf32>
    %103 = vector.broadcast %102 : vector<8x1xf32> to vector<8x8xf32>
    %104 = arith.subf %100, %103 : vector<8x8xf32>
    %105 = math.exp %104 : vector<8x8xf32>
    %cst_29 = arith.constant dense<0.000000e+00> : vector<8xf32>
    %106 = vector.multi_reduction <add>, %105, %cst_29 [1] : vector<8x8xf32> to vector<8xf32>
    %107 = vector.shape_cast %106 : vector<8xf32> to vector<8x1xf32>
    %108 = tpu.reciprocal %107 {approx = true} : vector<8x1xf32> -> vector<8x1xf32>
    %109 = vector.broadcast %108 : vector<8x1xf32> to vector<8x8xf32>
    %110 = arith.mulf %105, %109 : vector<8x8xf32>
    %cst_30 = arith.constant dense<0.000000e+00> : vector<8x32xf32>
    %111 = tpu.matmul %110, %99, %cst_30 {dimension_numbers = #tpu.dot_dimension_numbers<[1], [0], [0], [1], [0, 0, 1, 1], [], []>} : vector<8x8xf32>, vector<8x32xf32>, vector<8x32xf32> -> vector<8x32xf32>
    %112 = vector.extract_strided_slice %3 {offsets = [8, 96], sizes = [8, 32], strides = [1, 1]} : vector<16x128xf32> to vector<8x32xf32>
    %113 = vector.extract_strided_slice %4 {offsets = [8, 96], sizes = [8, 32], strides = [1, 1]} : vector<16x128xf32> to vector<8x32xf32>
    %114 = vector.extract_strided_slice %5 {offsets = [8, 96], sizes = [8, 32], strides = [1, 1]} : vector<16x128xf32> to vector<8x32xf32>
    %cst_31 = arith.constant dense<0.000000e+00> : vector<8x8xf32>
    %115 = tpu.matmul %112, %113, %cst_31 {dimension_numbers = #tpu.dot_dimension_numbers<[1], [1], [0], [0], [0, 0, 1, 0], [], []>} : vector<8x32xf32>, vector<8x32xf32>, vector<8x8xf32> -> vector<8x8xf32>
    %cst_32 = arith.constant dense<0xFF800000> : vector<8xf32>
    %116 = vector.multi_reduction <maximumf>, %115, %cst_32 [1] : vector<8x8xf32> to vector<8xf32>
    %117 = vector.shape_cast %116 : vector<8xf32> to vector<8x1xf32>
    %118 = vector.broadcast %117 : vector<8x1xf32> to vector<8x8xf32>
    %119 = arith.subf %115, %118 : vector<8x8xf32>
    %120 = math.exp %119 : vector<8x8xf32>
    %cst_33 = arith.constant dense<0.000000e+00> : vector<8xf32>
    %121 = vector.multi_reduction <add>, %120, %cst_33 [1] : vector<8x8xf32> to vector<8xf32>
    %122 = vector.shape_cast %121 : vector<8xf32> to vector<8x1xf32>
    %123 = tpu.reciprocal %122 {approx = true} : vector<8x1xf32> -> vector<8x1xf32>
    %124 = vector.broadcast %123 : vector<8x1xf32> to vector<8x8xf32>
    %125 = arith.mulf %120, %124 : vector<8x8xf32>
    %cst_34 = arith.constant dense<0.000000e+00> : vector<8x32xf32>
    %126 = tpu.matmul %125, %114, %cst_34 {dimension_numbers = #tpu.dot_dimension_numbers<[1], [0], [0], [1], [0, 0, 1, 1], [], []>} : vector<8x8xf32>, vector<8x32xf32>, vector<8x32xf32> -> vector<8x32xf32>
    %127 = tpu.concatenate %81, %96, %111, %126 in 1 : vector<8x32xf32>, vector<8x32xf32>, vector<8x32xf32>, vector<8x32xf32> -> vector<8x128xf32>
    %128 = tpu.concatenate %66, %127 in 0 : vector<8x128xf32>, vector<8x128xf32> -> vector<16x128xf32>
    %129 = arith.truncf %128 : vector<16x128xf32> to vector<16x128xbf16>
    %c0_35 = arith.constant 0 : index
    %c0_36 = arith.constant 0 : index
    %130 = vector.load %arg3[%c0_35, %c0_36] : memref<128x32xbf16, #tpu.memory_space<vmem>>, vector<128x32xbf16>
    %cst_37 = arith.constant dense<0.000000e+00> : vector<16x32xf32>
    %131 = tpu.matmul %129, %130, %cst_37 {dimension_numbers = #tpu.dot_dimension_numbers<[1], [0], [0], [1], [0, 0, 1, 1], [], []>} : vector<16x128xbf16>, vector<128x32xbf16>, vector<16x32xf32> -> vector<16x32xf32>
    %c0_38 = arith.constant 0 : index
    %c0_39 = arith.constant 0 : index
    %132 = vector.load %arg4[%c0_38, %c0_39] : memref<16x32xf32, #tpu.memory_space<vmem>>, vector<16x32xf32>
    tpu.vector_store %arg4[%c0_38, %c0_39], %131 {strides = array<i32>} : memref<16x32xf32, #tpu.memory_space<vmem>>, vector<16x32xf32>,
    return
  }
  func.func @transform_0(%arg0: i32) -> (i32, i32) {
    %c0_i32 = arith.constant 0 : i32
    %c0_i32_0 = arith.constant 0 : i32
    %c0_i32_1 = arith.constant 0 : i32
    return %c0_i32, %c0_i32_0 : i32, i32
  }
  func.func @transform_1(%arg0: i32) -> (i32, i32) {
    %c0_i32 = arith.constant 0 : i32
    %c0_i32_0 = arith.constant 0 : i32
    %c0_i32_1 = arith.constant 0 : i32
    return %c0_i32, %c0_i32_0 : i32, i32
  }
  func.func @transform_2(%arg0: i32) -> (i32, i32) {
    %c0_i32 = arith.constant 0 : i32
    %c0_i32_0 = arith.constant 0 : i32
    %c0_i32_1 = arith.constant 0 : i32
    return %c0_i32, %c0_i32_0 : i32, i32
  }
  func.func @transform_3(%arg0: i32) -> (i32, i32) {
    %c0_i32 = arith.constant 0 : i32
    %c0_i32_0 = arith.constant 0 : i32
    %c0_i32_1 = arith.constant 0 : i32
    return %c0_i32, %c0_i32_0 : i32, i32
  }
}

</mosaic_0001>

<bundles_post_ra>
// kernel: tpu_custom_call.1
= control target key start
LH: loop header
LB: loop body
LE: loop exit
PB: predicated region body
PF: predicated region fallthrough
CT: control target
= control target key end

     0   :  { %v1908_v2 = vmov 0   ;;  %v1909_v4 = vmov 0.0   ;;  %vm1910_vm0 = vmmov 0   ;;  %vm63_vm1 = vcmask 261120   ;;  %s2153_s0 = inlined_call_operand.vmem [shape: bf16[16,32], index: 0, kind: input, shape index: {}]   ;;  %s2154_s1 = inlined_call_operand.vmem [shape: bf16[32,384], index: 1, kind: input, shape index: {}]   ;;  %s2155_s2 = inlined_call_operand.vmem [shape: bf16[128,32], index: 2, kind: input, shape index: {}]   ;;  %s2156_s3 = inlined_call_operand.hbm [shape: f32[16,32], index: 3, kind: output, shape index: {}]  }
   0x1   :  { %v1837_v0 = vld [vmem:[%s2154_s1 + $0x1c] ss:$12 sps:$4 sm:$0xff]   ;;  %v1839_v1 = vld [vmem:[%s2154_s1 + $0x18] ss:$12 sps:$4 sm:$0xff]   ;;  %99 = vmatprep.mubr.bf16.mxu1 %v1908_v2  ;;  %1733 = vmatprep.subr.mxu0 %v1909_v4  ;;  %v1842_v5 = vld [vmem:[%s2154_s1] ss:$12 sps:$4 sm:$0xff]  }
   0x2   :  { %79 = vmatprep.subr.bf16.mxu1 %v1837_v0  ;;  %v1840_v3 = vld [vmem:[%s2154_s1 + $0x4] ss:$12 sps:$4 sm:$0xff]   ;;  %1735 = vmatprep.mubr.msk.f32.mxu0 %vm1910_vm0, %v1909_v4  ;;  %v1844_v7 = vld [vmem:[%s2154_s1 + $0x20] ss:$12 sps:$4 sm:$0xff]   ;;  %v1845_v8 = vld [vmem:[%s2154_s1 + $0x8] ss:$12 sps:$4 sm:$0xff]  }
   0x3   :  { %80 = vmatpush1.bf16.msra.mxu1 %v1839_v1  ;;  %v1843_v6 = vld [vmem:[%s2153_s0] sm:$0xff]  }
   0x4   :  { %81 = vmatprep.subr.bf16.mxu1 %v1840_v3 }
   0x7   :  { %82 = vmatpush1.bf16.msra.mxu1 %v1842_v5 }
   0x8   :  { %1705 = vmatprep.subr.bf16.mxu1 %v1909_v4 }
   0xa   :  { %1627 = vmatmul.mubr.msk.bf16.vlgmr.msra.gmra.mxu1 %vm63_vm1, %v1843_v6 }
   0xb   :  { %1706 = vmatpush3.bf16.msra.mxu1 %v1844_v7  ;;  %1709 = vmatprep.mubr.msk.bf16.mxu1 %vm1910_vm0, %v1909_v4 }
   0xc   :  { %8 = vsyncpa [#allocation3], 0  ;;  %1707 = vmatprep.subr.bf16.mxu1 %v1909_v4  ;;  %s1911_s0 = smov 96   ;;  %s1912_s1 = smov 64   ;;  %vm227_vm2 = vcmask 64512   ;;  %vm821_vm3 = vcmask 523264  }
   0xd   :  { %s1913_s26 = smov 32   ;;  %vm823_vm4 = vcmask 785408  }
   0xf   :  { %1708 = vmatpush3.bf16.msra.mxu1 %v1845_v8 }
  0x10   :  { %1713 = vmatprep.subr.mxu1 %v1909_v4 }
  0x12   :  { %1710 = vmatmul.mubr.msk.bf16.vlgmr.msra.gmra.mxu1 %vm63_vm1, %v1843_v6 }
  0x13   :  { %1715 = vmatprep.mubr.msk.f32.mxu1 %vm1910_vm0, %v1909_v4 }
  0xca   :  { %v101_v9 = vpop.f32.mrf.mxu1 }
  0xcc   :  { %v103_v10 = vpop.f32.mrf.mxu1 }
  0xcd   :  { %314 = vrot.lane.b32.xlu1 %v103_v10, %s1911_s0  ;;  %1714 = vmatpush3.xpose.msk.msra.mxu1 %vm63_vm1, %v103_v10 }
  0xce   :  { %1718 = vmatprep.subr.mxu1 %v1909_v4  ;;  %v105_v11 = vpop.f32.mrf.mxu1 }
  0xd0   :  { %1716 = vmatmul.mubr.msk.f32.vlgmr.msra.gmra.mxu1 %vm63_vm1, %v101_v9  ;;  %v107_v12 = vpop.f32.mrf.mxu1 }
  0xd1   :  { %312 = vrot.lane.b32.xlu1 %v101_v9, %s1911_s0  ;;  %1720 = vmatprep.mubr.msk.f32.mxu1 %vm1910_vm0, %v1909_v4 }
  0xd2   :  { %v1980_v13 = vpop.f32.mrf.mxu1 }
  0xd3   :  { %1719 = vmatpush3.msra.mxu1 %v1980_v13 }
  0xd4   :  { %v1711_v14 = vpop.f32.mrf.mxu1  ;;  %1723 = vmatprep.subr.mxu1 %v1909_v4 }
  0xd5   :  { %478 = vrot.lane.b32.xlu1 %v101_v9, %s1912_s1 }
  0xd6   :  { %v1985_v15 = vpop.f32.mrf.mxu1 }
  0xd8   :  { %v1712_v16 = vpop.f32.mrf.mxu1 }
  0xd9   :  { %645 = vrot.lane.b32.xlu1 %v103_v10, %s1913_s26 }
  0xdd   :  { %643 = vrot.lane.b32.xlu1 %v101_v9, %s1913_s26 }
  0xe1   :  { %987 = vrot.lane.b32.xlu1 %v107_v12, %s1911_s0 }
  0xe5   :  { %985 = vrot.lane.b32.xlu1 %v105_v11, %s1911_s0 }
  0xe9   :  { %1153 = vrot.lane.b32.xlu1 %v107_v12, %s1912_s1 }
  0xed   :  { %1318 = vrot.lane.b32.xlu1 %v107_v12, %s1913_s26 }
 0x13f   :  { %v315_v25 = vpop.permute.xlu1 %314 }
 0x143   :  { %v313_v26 = vpop.permute.xlu1 %312 }
 0x147   :  { %v479_v27 = vpop.permute.xlu1 %478 }
 0x14b   :  { %v646_v28 = vpop.permute.xlu1 %645 }
 0x14f   :  { %v644_v29 = vpop.permute.xlu1 %643 }
 0x153   :  { %v988_v32 = vpop.permute.xlu1 %987 }
 0x157   :  { %v986_v33 = vpop.permute.xlu1 %985 }
 0x15b   :  { %v1154_v36 = vpop.permute.xlu1 %1153 }
 0x15f   :  { %v1319_v38 = vpop.permute.xlu1 %1318 }
 0x190   :  { %v223_v17 = vpop.f32.mrf.mxu1 }
 0x191   :  { %v228_v18 = vsel %vm227_vm2, %v223_v17, -inf }
 0x192   :  { %229 = vmax.xlane.f32.xlu0 %v228_v18  ;;  %v1717_v19 = vpop.f32.mrf.mxu1 }
 0x21b   :  { %v230_v20 = vpop.xlane.xlu0 %229 }
 0x21c   :  { %v231_v21 = vsub.f32 %v223_v17, %v230_v20 }
 0x21e   :  { %v232_v22 = vmul.f32 1.442695, %v231_v21 }
 0x220   :  { %1854 = vpow2.f32 %v232_v22 }
 0x22d   :  { %v1855_v23 = vpop.eup %1854 }
 0x22e   :  { %v234_v24 = vsel %vm227_vm2, %v1855_v23, 0.0 }
 0x22f   :  { %235 = vadd.xlane.f32.xlu0 %v234_v24 }
 0x245   :  { %480 = vrot.lane.b32.xlu0 %v103_v10, %s1912_s1 }
 0x249   :  { %1151 = vrot.lane.b32.xlu0 %v105_v11, %s1912_s1 }
 0x24d   :  { %1316 = vrot.lane.b32.xlu0 %v105_v11, %s1913_s26 }
 0x2b8   :  { %v236_v30 = vpop.xlane.xlu0 %235 }
 0x2b9   :  { %1856 = vrcp.f32 %v236_v30 }
 0x2bc   :  { %v481_v31 = vpop.permute.xlu0 %480 }
 0x2bd   :  { %1734 = vmatpush3.xpose.msk.msra.mxu0 %vm63_vm1, %v481_v31 }
 0x2be   :  { %1743 = vmatprep.subr.mxu0 %v1909_v4 }
 0x2c0   :  { %1736 = vmatmul.mubr.msk.f32.vlgmr.msra.gmra.mxu0 %vm63_vm1, %v479_v27  ;;  %v1152_v37 = vpop.permute.xlu0 %1151 }
 0x2c1   :  { %1744 = vmatpush3.xpose.msk.msra.mxu0 %vm63_vm1, %v646_v28  ;;  %1745 = vmatprep.mubr.msk.f32.mxu0 %vm1910_vm0, %v1909_v4 }
 0x2c2   :  { %1753 = vmatprep.subr.mxu0 %v1909_v4 }
 0x2c4   :  { %1746 = vmatmul.mubr.msk.f32.vlgmr.msra.gmra.mxu0 %vm63_vm1, %v644_v29  ;;  %v1317_v39 = vpop.permute.xlu0 %1316 }
 0x2c5   :  { %1754 = vmatpush3.xpose.msk.msra.mxu0 %vm63_vm1, %v107_v12  ;;  %1755 = vmatprep.mubr.msk.f32.mxu0 %vm1910_vm0, %v1909_v4 }
 0x2c6   :  { %v1857_v34 = vpop.eup %1856  ;;  %1763 = vmatprep.subr.mxu0 %v1909_v4 }
 0x2c7   :  { %v238_v35 = vmul.f32 %v1857_v34, %v1855_v23 }
 0x2c8   :  { %1756 = vmatmul.mubr.msk.f32.vlgmr.msra.gmra.mxu0 %vm63_vm1, %v105_v11 }
 0x2c9   :  { %1721 = vmatmul.mubr.msk.f32.vlgmr.msra.gmra.mxu1 %vm227_vm2, %v238_v35  ;;  %1764 = vmatpush3.xpose.msk.msra.mxu0 %vm63_vm1, %v988_v32 }
 0x2ca   :  { %1724 = vmatpush3.xpose.msk.msra.mxu1 %vm63_vm1, %v315_v25  ;;  %1765 = vmatprep.mubr.msk.f32.mxu0 %vm1910_vm0, %v1909_v4 }
 0x2cb   :  { %1725 = vmatprep.mubr.msk.f32.mxu1 %vm1910_vm0, %v1909_v4  ;;  %1773 = vmatprep.subr.mxu0 %v1909_v4 }
 0x2cc   :  { %1766 = vmatmul.mubr.msk.f32.vlgmr.msra.gmra.mxu0 %vm63_vm1, %v986_v33  ;;  %1728 = vmatprep.subr.mxu1 %v1909_v4 }
 0x2cd   :  { %1726 = vmatmul.mubr.msk.f32.vlgmr.msra.gmra.mxu1 %vm63_vm1, %v313_v26  ;;  %1774 = vmatpush3.xpose.msk.msra.mxu0 %vm63_vm1, %v1154_v36 }
 0x2ce   :  { %1775 = vmatprep.mubr.msk.f32.mxu0 %vm1910_vm0, %v1909_v4  ;;  %1783 = vmatprep.subr.mxu0 %v1909_v4 }
 0x2cf   :  { %1730 = vmatprep.mubr.msk.f32.mxu1 %vm1910_vm0, %v1909_v4 }
 0x2d0   :  { %1776 = vmatmul.mubr.msk.f32.vlgmr.msra.gmra.mxu0 %vm63_vm1, %v1152_v37 }
 0x2d1   :  { %1784 = vmatpush3.xpose.msk.msra.mxu0 %vm63_vm1, %v1319_v38  ;;  %1785 = vmatprep.mubr.msk.f32.mxu0 %vm1910_vm0, %v1909_v4 }
 0x2d2   :  { %1793 = vmatprep.subr.bf16.mxu0 %v1909_v4 }
 0x2d4   :  { %1786 = vmatmul.mubr.msk.f32.vlgmr.msra.gmra.mxu0 %vm63_vm1, %v1317_v39 }
 0x2d5   :  { %1809 = vmatprep.mubr.msk.bf16.mxu0 %vm1910_vm0, %v1909_v4 }
 0x380   :  { %v552_v40 = vpop.f32.mrf.mxu0 }
 0x381   :  { %v556_v41 = vsel %vm227_vm2, %v552_v40, -inf }
 0x382   :  { %557 = vmax.xlane.f32.xlu0 %v556_v41  ;;  %v1737_v42 = vpop.f32.mrf.mxu0 }
 0x384   :  { %v717_v43 = vpop.f32.mrf.mxu0 }
 0x385   :  { %v721_v44 = vsel %vm227_vm2, %v717_v43, -inf }
 0x386   :  { %722 = vmax.xlane.f32.xlu0 %v721_v44  ;;  %v1747_v45 = vpop.f32.mrf.mxu0 }
 0x388   :  { %v897_v46 = vpop.f32.mrf.mxu0 }
 0x389   :  { %v2035_v47 = vpop.f32.mrf.mxu1  ;;  %v901_v58 = vsel %vm227_vm2, %v897_v46, -inf }
 0x38a   :  { %v1757_v48 = vpop.f32.mrf.mxu0 }
 0x38b   :  { %v1722_v49 = vpop.f32.mrf.mxu1 }
 0x38c   :  { %v1059_v50 = vpop.f32.mrf.mxu0 }
 0x38d   :  { %v2037_v51 = vpop.f32.mrf.mxu1  ;;  %v1063_v52 = vsel %vm227_vm2, %v1059_v50, -inf }
 0x38e   :  { %1064 = vmax.xlane.f32.xlu0 %v1063_v52  ;;  %v1767_v53 = vpop.f32.mrf.mxu0  ;;  %v390_v54 = vsel %vm227_vm2, %v2037_v51, -inf }
 0x38f   :  { %391 = vmax.xlane.f32.xlu1 %v390_v54  ;;  %v1727_v55 = vpop.f32.mrf.mxu1 }
 0x390   :  { %v1225_v56 = vpop.f32.mrf.mxu0 }
 0x391   :  { %v1229_v62 = vsel %vm227_vm2, %v1225_v56, -inf }
 0x392   :  { %v1777_v57 = vpop.f32.mrf.mxu0 }
 0x393   :  { %902 = vmax.xlane.f32.xlu1 %v901_v58 }
 0x394   :  { %v1390_v59 = vpop.f32.mrf.mxu0 }
 0x395   :  { %v1394_v60 = vsel %vm227_vm2, %v1390_v59, -inf }
 0x396   :  { %1395 = vmax.xlane.f32.xlu0 %v1394_v60  ;;  %v1787_v61 = vpop.f32.mrf.mxu0 }
 0x397   :  { %1230 = vmax.xlane.f32.xlu1 %v1229_v62 }
 0x40b   :  { %v558_v63 = vpop.xlane.xlu0 %557 }
 0x40c   :  { %v559_v0 = vsub.f32 %v552_v40, %v558_v63  ;;  %v1846_v63 = vld [vmem:[%s2155_s2 + $0x38] sm:$0xff]  }
 0x40d   :  { %1794 = vmatpush3.bf16.msra.mxu0 %v1846_v63 }
 0x40e   :  { %v560_v1 = vmul.f32 1.442695, %v559_v0  ;;  %v1847_v0 = vld [vmem:[%s2155_s2 + $0x30] sm:$0xff]   ;;  %1795 = vmatprep.subr.bf16.mxu0 %v1909_v4 }
 0x40f   :  { %v723_v2 = vpop.xlane.xlu0 %722 }
 0x410   :  { %1858 = vpow2.f32 %v560_v1  ;;  %v724_v3 = vsub.f32 %v717_v43, %v723_v2  ;;  %v1848_v1 = vld [vmem:[%s2155_s2 + $0x28] sm:$0xff]   ;;  %v1849_v2 = vld [vmem:[%s2155_s2 + $0x20] sm:$0xff]  }
 0x411   :  { %1796 = vmatpush3.bf16.msra.mxu0 %v1847_v0 }
 0x412   :  { %v725_v5 = vmul.f32 1.442695, %v724_v3  ;;  %1797 = vmatprep.subr.bf16.mxu0 %v1909_v4  ;;  %v1850_v3 = vld [vmem:[%s2155_s2 + $0x18] sm:$0xff]  }
 0x414   :  { %1860 = vpow2.f32 %v725_v5 }
 0x415   :  { %1798 = vmatpush3.bf16.msra.mxu0 %v1848_v1 }
 0x416   :  { %1799 = vmatprep.subr.bf16.mxu0 %v1909_v4 }
 0x417   :  { %v1065_v6 = vpop.xlane.xlu0 %1064 }
 0x418   :  { %v1066_v7 = vsub.f32 %v1059_v50, %v1065_v6  ;;  %v392_v8 = vpop.xlane.xlu1 %391 }
 0x419   :  { %v393_v33 = vsub.f32 %v2037_v51, %v392_v8  ;;  %1800 = vmatpush3.bf16.msra.mxu0 %v1849_v2 }
 0x41a   :  { %v1067_v9 = vmul.f32 1.442695, %v1066_v7  ;;  %1801 = vmatprep.subr.bf16.mxu0 %v1909_v4 }
 0x41b   :  { %v394_v34 = vmul.f32 1.442695, %v393_v33 }
 0x41c   :  { %1862 = vpow2.f32 %v1067_v9  ;;  %v903_v10 = vpop.xlane.xlu1 %902  ;;  %v1851_v9 = vld [vmem:[%s2155_s2 + $0x10] sm:$0xff]  }
 0x41d   :  { %v2045_v11 = vpop.eup %1858  ;;  %v904_v12 = vsub.f32 %v897_v46, %v903_v10  ;;  %1802 = vmatpush3.bf16.msra.mxu0 %v1850_v3 }
 0x41e   :  { %v562_v14 = vsel %vm227_vm2, %v2045_v11, 0.0  ;;  %1803 = vmatprep.subr.bf16.mxu0 %v1909_v4 }
 0x41f   :  { %v905_v16 = vmul.f32 1.442695, %v904_v12  ;;  %563 = vadd.xlane.f32.xlu0 %v562_v14  ;;  %v1396_v17 = vpop.xlane.xlu0 %1395  ;;  %v1852_v12 = vld [vmem:[%s2155_s2 + $0x8] sm:$0xff]  }
 0x420   :  { %v1397_v18 = vsub.f32 %v1390_v59, %v1396_v17  ;;  %v1231_v19 = vpop.xlane.xlu1 %1230  ;;  %v1853_v17 = vld [vmem:[%s2155_s2] sm:$0xff]   ;;  %s1914_s2 = smov [#allocation2]  }
 0x421   :  { %v2049_v20 = vpop.eup %1860  ;;  %1864 = vpow2.f32 %v905_v16  ;;  %v1232_v21 = vsub.f32 %v1225_v56, %v1231_v19  ;;  %1804 = vmatpush3.bf16.msra.mxu0 %v1851_v9  ;;  %s1609_s16 = sshll.u32 %s1914_s2, 4  ;;  %s1610_s16 = int_to_ptr.vmem [resolvable:$true] %s1609_s16 }
 0x422   :  { %v1398_v22 = vmul.f32 1.442695, %v1397_v18  ;;  %v727_v23 = vsel %vm227_vm2, %v2049_v20, 0.0  ;;  %1805 = vmatprep.subr.bf16.mxu0 %v1909_v4  ;;  %s1886_s17 = scalar_lea.vmem %s1610_s16, 256  ;;  %p1891_p1 = scmp.lt.s32.totalorder %s1610_s16, %s1610_s16 }
 0x423   :  { %v1233_v24 = vmul.f32 1.442695, %v1232_v21  ;;  %728 = vadd.xlane.f32.xlu1 %v727_v23  ;;  %p1887_p0 = scmp.ne.s32.totalorder %s1610_s16, %s1886_s17  ;;  %p1892_p2 = scmp.lt.s32.totalorder %s1886_s17, %s1886_s17 }
 0x424   :  { %1866 = vpow2.f32 %v1398_v22 }
 0x425   :  { %1868 = vpow2.f32 %v1233_v24  ;;  %1806 = vmatpush3.bf16.msra.mxu0 %v1852_v12  ;;  %p1893_p3 = por %p1892_p2, %p1891_p1 }
 0x426   :  { %1870 = vpow2.f32 %v394_v34  ;;  %1807 = vmatprep.subr.bf16.mxu0 %v1909_v4 }
 0x427   :  { %p1894_p4 = pnand %p1893_p3, %p1887_p0 }
 0x429   :  { %v2053_v25 = vpop.eup %1862  ;;  %1808 = vmatpush3.bf16.msra.mxu0 %v1853_v17 }
 0x42a   :  { %v1069_v26 = vsel %vm227_vm2, %v2053_v25, 0.0 }
 0x42b   :  { %1070 = vadd.xlane.f32.xlu1 %v1069_v26 }
 0x42e   :  { %v1865_v27 = vpop.eup %1864 }
 0x42f   :  { %v907_v28 = vsel %vm227_vm2, %v1865_v27, 0.0 }
 0x430   :  { %908 = vadd.xlane.f32.xlu0 %v907_v28 }
 0x431   :  { %v2058_v29 = vpop.eup %1866 }
 0x432   :  { %v2060_v30 = vpop.eup %1868  ;;  %v1400_v31 = vsel %vm227_vm2, %v2058_v29, 0.0 }
 0x433   :  { %1401 = vadd.xlane.f32.xlu1 %v1400_v31  ;;  %v1235_v32 = vsel %vm227_vm2, %v2060_v30, 0.0  ;;  %v1871_v35 = vpop.eup %1870 }
 0x434   :  { %1236 = vadd.xlane.f32.xlu0 %v1235_v32  ;;  %v396_v36 = vsel %vm227_vm2, %v1871_v35, 0.0 }
 0x444   :  { %567 = vrot.lane.b32.xlu1 %v1980_v13, %s1912_s1 }
 0x44a   :  { %402 = vrot.lane.b32.xlu0 %v1980_v13, %s1911_s0 }
 0x44e   :  { %1075 = vrot.lane.b32.xlu0 %v1985_v15, %s1911_s0 }
 0x452   :  { %1405 = vrot.lane.b32.xlu0 %v1985_v15, %s1913_s26 }
 0x468   :  { %397 = vadd.xlane.f32.xlu1 %v396_v36 }
 0x479   :  { %732 = vrot.lane.b32.xlu1 %v1980_v13, %s1913_s26 }
 0x47d   :  { %1240 = vrot.lane.b32.xlu1 %v1985_v15, %s1912_s1 }
 0x4a8   :  { %v564_v37 = vpop.xlane.xlu0 %563 }
 0x4ac   :  { %v729_v41 = vpop.xlane.xlu1 %728 }
 0x4b4   :  { %v1071_v42 = vpop.xlane.xlu1 %1070 }
 0x4b9   :  { %v909_v38 = vpop.xlane.xlu0 %908 }
 0x4bc   :  { %v1402_v43 = vpop.xlane.xlu1 %1401 }
 0x4bd   :  { %v1237_v39 = vpop.xlane.xlu0 %1236 }
 0x4c0   :  { %v568_v44 = vpop.permute.xlu1 %567 }
 0x4c1   :  { %v403_v40 = vpop.permute.xlu0 %402 }
 0x4c2   :  { %1729 = vmatpush3.msra.mxu1 %v403_v40 }
 0x4c3   :  { %1738 = vmatprep.subr.mxu1 %v1909_v4 }
 0x4c5   :  { %v1076_v56 = vpop.permute.xlu0 %1075 }
 0x4c9   :  { %v1406_v61 = vpop.permute.xlu0 %1405 }
 0x4f1   :  { %v398_v45 = vpop.xlane.xlu1 %397 }
 0x4f2   :  { %1872 = vrcp.f32 %v398_v45 }
 0x4f3   :  { %1874 = vrcp.f32 %v564_v37 }
 0x4f4   :  { %1876 = vrcp.f32 %v729_v41 }
 0x4f5   :  { %1878 = vrcp.f32 %v909_v38  ;;  %v733_v51 = vpop.permute.xlu1 %732 }
 0x4f6   :  { %1880 = vrcp.f32 %v1071_v42 }
 0x4f7   :  { %1882 = vrcp.f32 %v1237_v39 }
 0x4f8   :  { %1884 = vrcp.f32 %v1402_v43 }
 0x4ff   :  { %v1873_v13 = vpop.eup %1872 }
 0x500   :  { %v400_v46 = vmul.f32 %v1873_v13, %v1871_v35  ;;  %v1875_v48 = vpop.eup %1874 }
 0x501   :  { %v566_v49 = vmul.f32 %v1875_v48, %v2045_v11  ;;  %v1877_v50 = vpop.eup %1876 }
 0x502   :  { %1731 = vmatmul.mubr.msk.f32.vlgmr.msra.gmra.mxu1 %vm227_vm2, %v400_v46  ;;  %v731_v52 = vmul.f32 %v1877_v50, %v2049_v20  ;;  %v1879_v53 = vpop.eup %1878 }
 0x503   :  { %1739 = vmatpush3.msra.mxu1 %v568_v44  ;;  %1740 = vmatprep.mubr.msk.f32.mxu1 %vm1910_vm0, %v1909_v4  ;;  %v911_v54 = vmul.f32 %v1879_v53, %v1865_v27  ;;  %v1881_v55 = vpop.eup %1880 }
 0x504   :  { %1748 = vmatprep.subr.mxu1 %v1909_v4  ;;  %v1073_v57 = vmul.f32 %v1881_v55, %v2053_v25  ;;  %v1883_v58 = vpop.eup %1882 }
 0x505   :  { %v1239_v59 = vmul.f32 %v1883_v58, %v2060_v30  ;;  %v1885_v60 = vpop.eup %1884 }
 0x506   :  { %1741 = vmatmul.mubr.msk.f32.vlgmr.msra.gmra.mxu1 %vm227_vm2, %v566_v49  ;;  %v1404_v62 = vmul.f32 %v1885_v60, %v2058_v29 }
 0x507   :  { %1749 = vmatpush3.msra.mxu1 %v733_v51  ;;  %1750 = vmatprep.mubr.msk.f32.mxu1 %vm1910_vm0, %v1909_v4 }
 0x508   :  { %1758 = vmatprep.subr.mxu1 %v1909_v4 }
 0x50a   :  { %1751 = vmatmul.mubr.msk.f32.vlgmr.msra.gmra.mxu1 %vm227_vm2, %v731_v52 }
 0x50b   :  { %1759 = vmatpush3.msra.mxu1 %v1985_v15  ;;  %1760 = vmatprep.mubr.msk.f32.mxu1 %vm1910_vm0, %v1909_v4  ;;  %v1241_v15 = vpop.permute.xlu1 %1240 }
 0x50c   :  { %1768 = vmatprep.subr.mxu1 %v1909_v4 }
 0x50e   :  { %1761 = vmatmul.mubr.msk.f32.vlgmr.msra.gmra.mxu1 %vm227_vm2, %v911_v54 }
 0x50f   :  { %1769 = vmatpush3.msra.mxu1 %v1076_v56  ;;  %1770 = vmatprep.mubr.msk.f32.mxu1 %vm1910_vm0, %v1909_v4 }
 0x510   :  { %1778 = vmatprep.subr.mxu1 %v1909_v4 }
 0x512   :  { %1771 = vmatmul.mubr.msk.f32.vlgmr.msra.gmra.mxu1 %vm227_vm2, %v1073_v57 }
 0x513   :  { %1779 = vmatpush3.msra.mxu1 %v1241_v15  ;;  %1780 = vmatprep.mubr.msk.f32.mxu1 %vm1910_vm0, %v1909_v4 }
 0x514   :  { %1788 = vmatprep.subr.mxu1 %v1909_v4 }
 0x516   :  { %1781 = vmatmul.mubr.msk.f32.vlgmr.msra.gmra.mxu1 %vm227_vm2, %v1239_v59 }
 0x517   :  { %1789 = vmatpush3.msra.mxu1 %v1406_v61  ;;  %1790 = vmatprep.mubr.msk.f32.mxu1 %vm1910_vm0, %v1909_v4 }
 0x51a   :  { %1791 = vmatmul.mubr.msk.f32.vlgmr.msra.gmra.mxu1 %vm227_vm2, %v1404_v62 }
 0x5c2   :  { %v474_v5 = vpop.f32.mrf.mxu1 }
 0x5c4   :  { %v1732_v6 = vpop.f32.mrf.mxu1 }
 0x5c6   :  { %v639_v7 = vpop.f32.mrf.mxu1 }
 0x5c8   :  { %v1742_v8 = vpop.f32.mrf.mxu1 }
 0x5ca   :  { %v804_v10 = vpop.f32.mrf.mxu1 }
 0x5cc   :  { %v1752_v11 = vpop.f32.mrf.mxu1 }
 0x5ce   :  { %v981_v14 = vpop.f32.mrf.mxu1 }
 0x5d0   :  { %v1762_v16 = vpop.f32.mrf.mxu1 }
 0x5d2   :  { %v1147_v18 = vpop.f32.mrf.mxu1 }
 0x5d3   :  { %v1822_v19 = vpack.i.bf16 %v1147_v18, %v474_v5 }
 0x5d4   :  { %v1772_v20 = vpop.f32.mrf.mxu1 }
 0x5d5   :  { %1823 = vrot.lane.b32.xlu1 %v1822_v19, %s1913_s26 }
 0x5d6   :  { %v1312_v21 = vpop.f32.mrf.mxu1 }
 0x5d7   :  { %v1827_v22 = vpack.i.bf16 %v1312_v21, %v639_v7 }
 0x5d8   :  { %v1782_v23 = vpop.f32.mrf.mxu1 }
 0x5d9   :  { %1828 = vrot.lane.b32.xlu0 %v1827_v22, %s1912_s1 }
 0x5da   :  { %v1477_v24 = vpop.f32.mrf.mxu1 }
 0x5db   :  { %v1832_v25 = vpack.i.bf16 %v1477_v24, %v804_v10 }
 0x5dc   :  { %v1792_v26 = vpop.f32.mrf.mxu1 }
 0x5dd   :  { %1833 = vrot.lane.b32.xlu1 %v1832_v25, %s1911_s0 }
 0x647   :  { %v1824_v4 = vpop.permute.xlu1 %1823 }
 0x648   :  { %v1826_v28 = vunpack.i.h.bf16 %v1824_v4  ;;  %v1825_v29 = vunpack.i.l.bf16 %v1824_v4 }
 0x64a   :  { %v1493_v33 = vsel %vm63_vm1, %v981_v14, %v1826_v28  ;;  %v820_v34 = vsel %vm63_vm1, %v2035_v47, %v1825_v29 }
 0x64b   :  { %v1829_v27 = vpop.permute.xlu0 %1828 }
 0x64c   :  { %v1831_v30 = vunpack.i.h.bf16 %v1829_v27  ;;  %v1830_v31 = vunpack.i.l.bf16 %v1829_v27 }
 0x64e   :  { %v1494_v37 = vsel %vm821_vm3, %v1493_v33, %v1831_v30  ;;  %v822_v38 = vsel %vm821_vm3, %v820_v34, %v1830_v31 }
 0x64f   :  { %v1834_v32 = vpop.permute.xlu1 %1833 }
 0x650   :  { %v1836_v35 = vunpack.i.h.bf16 %v1834_v32  ;;  %v1835_v36 = vunpack.i.l.bf16 %v1834_v32 }
 0x652   :  { %v1495_v39 = vsel %vm823_vm4, %v1494_v37, %v1836_v35  ;;  %v824_v40 = vsel %vm823_vm4, %v822_v38, %v1835_v36 }
 0x653   :  { %v1496_v41 = vpack.c.bf16 %v1495_v39, %v824_v40 }
 0x655   :  { %1810 = vmatmul.mubr.bf16.vlgmr.msra.gmra.mxu0 %v1496_v41 }
 0x715   :  { %v1595_v42 = vpop.f32.mrf.mxu0 }
 0x716   :  { %1602 = vst.msk [vmem:[#allocation2] sm:$0xff] %vm63_vm1, %v1595_v42 }
 0x717   :  { %v1811_v43 = vpop.f32.mrf.mxu0 }
 0x719   :  { %v1598_v44 = vpop.f32.mrf.mxu0 }
 0x71a   :  { %1603 = vst.msk [vmem:[#allocation2 + $0x8] sm:$0xff] %vm63_vm1, %v1598_v44 }
 0x71b   :  { %v1812_v45 = vpop.f32.mrf.mxu0 }
 0x71c   :  { %1897 = shalt.err (!%p1894_p4)
}
 0x71d   :  { %s1915_s18 = smov 128   ;;  %s1916_s19 = smov 8  }
 0x71e   :  { %1615 = dma.vmem_to_hbm [thread:$0]  %s1610_s16, 256, %s2156_s3, [#allocation3], %s1915_s18, %s1915_s18, %s1916_s19  }
 0x71f   :  { %1906 = dma.done.wait [#allocation3], 256  }
 0x720   :  { %1907 = vsyncadd [#allocation3], 4294967040 }
 0x721   :  { %1619 = vsyncpa [#allocation3], 1 }

</bundles_post_ra>
